<compile_context>
chip_gen: v6e
topology: v6e:2x2x1
jax: 0.10.0
libtpu: 0.0.40
codegen_flags: <defaults>
</compile_context>

<pallas_src>
import functools

import jax
import jax.numpy as jnp
from jax.experimental import pallas as pl
from jax.experimental.pallas import tpu as pltpu


def _round_up(x, m):
    return ((x + m - 1) // m) * m


def _rowloss_kernel(preds_ref, target_ref, loss_ref, *, quantiles):
    """Per-row quantile loss for one (tb, P)/(tb, T) tile -> (tb, 1)."""
    preds = preds_ref[...].astype(jnp.float32)      # (tb, P)
    tgt = target_ref[...].astype(jnp.float32)       # (tb, T)

    # Per-quantile accumulation on (tb, 1) columns: no (P, tb) gathered
    # target / err / pin temporaries, no cross-sublane reduction.
    acc = jnp.abs(tgt[:, 0:1] - preds[:, 0:1])      # (tb, 1)
    if quantiles:
        t1 = tgt[:, 1:2]
        t2 = tgt[:, 2:3]
        for i, q in enumerate(quantiles):
            q = float(q)
            e = t1 - preds[:, 2 * i + 1:2 * i + 2]
            acc = acc + jnp.maximum((q - 1.0) * e, q * e)
            e = t2 - preds[:, 2 * i + 2:2 * i + 3]
            acc = acc + jnp.maximum((q - 1.0) * e, q * e)
    loss_ref[...] = acc


def _rowloss_jax(preds, target, quantiles):
    """Fused pure-JAX row losses (small-B fallback)."""
    p = preds.astype(jnp.float32)
    t = target.astype(jnp.float32)
    acc = jnp.abs(t[:, 0] - p[:, 0])
    for i, q in enumerate(quantiles):
        q = float(q)
        e = t[:, 1] - p[:, 2 * i + 1]
        acc = acc + jnp.maximum((q - 1.0) * e, q * e)
        e = t[:, 2] - p[:, 2 * i + 2]
        acc = acc + jnp.maximum((q - 1.0) * e, q * e)
    return acc


class QuantileLoss:
    """JAX/Pallas equivalent of the PyTorch QuantileLoss module."""

    def __init__(self, quantiles, reduce='mean', block_rows=None,
                 min_pallas_rows=4096):
        self.quantiles = tuple(float(q) for q in quantiles)
        self.reduce = reduce
        self._block_rows = block_rows          # optional override (tuning / tests)
        self._min_pallas_rows = min_pallas_rows

    def _choose_tile(self, B):
        if self._block_rows is not None:
            tb = _round_up(int(self._block_rows), 8)
        else:
            # Natural-layout VMEM cost: every (tb, cols) f32 pipeline buffer
            # pads its lane dim to 128 -> 512 B/row/buffer.  3 buffers
            # (preds, target, loss) x 2 (double buffering) + ~4 (tb, 1)
            # elementwise temporaries => ~5 KiB/row.  Budget ~10 MiB keeps us
            # well under v5e's 16 MiB scoped-VMEM default (and v7x's 32 MiB).
            bytes_per_row = (3 * 2 + 4) * 128 * 4
            budget = 10 * 1024 * 1024
            tb = max(256, (budget // bytes_per_row) // 8 * 8)   # -> 2048
        return min(tb, _round_up(B, 8))

    def __call__(self, preds, target):
        assert preds.shape[0] == target.shape[0]
        B = preds.shape[0]
        Q = len(self.quantiles)
        P = 1 + 2 * Q
        T = 1 if Q == 0 else 3

        if self.reduce is not False and self.reduce != 'mean':
            # TODO(synk): the torch module defines no other reduce modes
            # (it implicitly returns None); mirror that behavior.
            return None

        # No-op when the inputs already have exactly the columns the loss
        # reads (the usual case); otherwise slice so the kernel DMA does not
        # pull unused columns.
        preds_u = preds if preds.shape[1] == P else preds[:, :P]
        target_u = target if target.shape[1] == T else target[:, :T]

        # Small-B fallback: launch + per-grid-step overhead dominates a
        # Pallas kernel at these sizes; a fused XLA expression is cheaper.
        if B < self._min_pallas_rows:
            rows = _rowloss_jax(preds_u, target_u, self.quantiles)
            return jnp.mean(rows) if self.reduce == 'mean' else rows

        tb = self._choose_tile(B)
        grid = (pl.cdiv(B, tb),)   # partial last block is clipped by Pallas

        kernel = functools.partial(_rowloss_kernel, quantiles=self.quantiles)
        rows = pl.pallas_call(
            kernel,
            out_shape=jax.ShapeDtypeStruct((B, 1), jnp.float32),
            grid=grid,
            in_specs=[
                pl.BlockSpec((tb, P), lambda i: (i, 0)),
                pl.BlockSpec((tb, T), lambda i: (i, 0)),
            ],
            out_specs=pl.BlockSpec((tb, 1), lambda i: (i, 0)),
            compiler_params=pltpu.CompilerParams(
                dimension_semantics=("parallel",)),
        )(preds_u, target_u)
        rows = rows[:, 0]

        if self.reduce == 'mean':
            # Tiny (4 B/row) reduction done outside the kernel: keeps the
            # grid axis "parallel" (both v7x TensorCores usable) instead of a
            # cross-step (1,1) accumulator pinned to one core.
            return jnp.mean(rows)
        return rows


def _reference(preds, target, quantiles, reduce='mean'):
    """Pure-JAX reference mirroring the PyTorch forward exactly."""
    losses = [jnp.abs(target[:, 0] - preds[:, 0])[:, None]]
    for i, q in enumerate(quantiles):
        e = target[:, 1] - preds[:, i * 2 + 1]
        losses.append(jnp.maximum((q - 1) * e, q * e)[:, None])
        e = target[:, 2] - preds[:, i * 2 + 2]
        losses.append(jnp.maximum((q - 1) * e, q * e)[:, None])
    loss = jnp.sum(jnp.concatenate(losses, axis=1), axis=1)
    if reduce is False:
        return loss
    if reduce == 'mean':
        return jnp.mean(loss)


if __name__ == "__main__":
    quantiles = [0.25, 0.75]
    P = 1 + 2 * len(quantiles)   # 5 prediction columns

    key = jax.random.PRNGKey(0)

    # (B, block_rows, min_pallas_rows):
    #   B=8    -> small-B pure-JAX fallback path
    #   B=300  -> Pallas path, 128-row tiles, 3 grid steps, partial last tile
    #   B=4100 -> Pallas path with default tiling (tb=2048), partial last tile
    cases = (
        (8, None, 4096),
        (300, 128, 0),
        (4100, None, 4096),
    )

    for B, block_rows, min_rows in cases:
        kp, kt = jax.random.split(jax.random.fold_in(key, B))
        preds = jax.random.normal(kp, (B, P), dtype=jnp.float32)
        target = jax.random.normal(kt, (B, 3), dtype=jnp.float32)

        loss_mean = QuantileLoss(quantiles, reduce='mean', block_rows=block_rows,
                                 min_pallas_rows=min_rows)(preds, target)
        loss_vec = QuantileLoss(quantiles, reduce=False, block_rows=block_rows,
                                min_pallas_rows=min_rows)(preds, target)
        loss_mean = jax.block_until_ready(loss_mean)
        loss_vec = jax.block_until_ready(loss_vec)

        ref_mean = _reference(preds, target, quantiles, reduce='mean')
        ref_vec = _reference(preds, target, quantiles, reduce=False)

        assert loss_vec.shape == (B,), (B, loss_vec.shape)
        assert jnp.allclose(loss_vec, ref_vec, atol=1e-5, rtol=1e-5), (B,)
        assert jnp.allclose(loss_mean, ref_mean, atol=1e-5, rtol=1e-5), (
            B, loss_mean, ref_mean)

    print("KERNEL_OK")
</pallas_src>

<mosaic_0001>
module attributes {stable_mosaic.version = 11 : i64} {
  func.func @_rowloss_kernel(%arg0: i32, %arg1: memref<128x5xf32, #tpu.memory_space<vmem>>, %arg2: memref<128x3xf32, #tpu.memory_space<vmem>>, %arg3: memref<128x1xf32, #tpu.memory_space<vmem>>) attributes {dimension_semantics = [#tpu.dimension_semantics<parallel>], iteration_bounds = array<i64: 3>, scalar_prefetch = 0 : i64, scratch_operands = 0 : i64, tpu.core_type = #tpu.core_type<tc>, window_params = [{transform_indices = @transform_0, window_bounds = array<i64: 128, 5>}, {transform_indices = @transform_1, window_bounds = array<i64: 128, 3>}, {transform_indices = @transform_2, window_bounds = array<i64: 128, 1>}]} {
    %c0 = arith.constant 0 : index
    %c0_0 = arith.constant 0 : index
    %0 = vector.load %arg1[%c0, %c0_0] : memref<128x5xf32, #tpu.memory_space<vmem>>, vector<128x5xf32>
    %c0_1 = arith.constant 0 : index
    %c0_2 = arith.constant 0 : index
    %1 = vector.load %arg2[%c0_1, %c0_2] : memref<128x3xf32, #tpu.memory_space<vmem>>, vector<128x3xf32>
    %2 = vector.extract_strided_slice %1 {offsets = [0, 0], sizes = [128, 1], strides = [1, 1]} : vector<128x3xf32> to vector<128x1xf32>
    %3 = vector.extract_strided_slice %0 {offsets = [0, 0], sizes = [128, 1], strides = [1, 1]} : vector<128x5xf32> to vector<128x1xf32>
    %4 = arith.subf %2, %3 : vector<128x1xf32>
    %5 = math.absf %4 : vector<128x1xf32>
    %6 = vector.extract_strided_slice %1 {offsets = [0, 1], sizes = [128, 1], strides = [1, 1]} : vector<128x3xf32> to vector<128x1xf32>
    %7 = vector.extract_strided_slice %1 {offsets = [0, 2], sizes = [128, 1], strides = [1, 1]} : vector<128x3xf32> to vector<128x1xf32>
    %8 = vector.extract_strided_slice %0 {offsets = [0, 1], sizes = [128, 1], strides = [1, 1]} : vector<128x5xf32> to vector<128x1xf32>
    %9 = arith.subf %6, %8 : vector<128x1xf32>
    %cst = arith.constant -7.500000e-01 : f32
    %10 = vector.broadcast %cst : f32 to vector<128x1xf32>
    %11 = arith.mulf %10, %9 : vector<128x1xf32>
    %cst_3 = arith.constant 2.500000e-01 : f32
    %12 = vector.broadcast %cst_3 : f32 to vector<128x1xf32>
    %13 = arith.mulf %12, %9 : vector<128x1xf32>
    %14 = arith.maximumf %11, %13 : vector<128x1xf32>
    %15 = arith.addf %5, %14 : vector<128x1xf32>
    %16 = vector.extract_strided_slice %0 {offsets = [0, 2], sizes = [128, 1], strides = [1, 1]} : vector<128x5xf32> to vector<128x1xf32>
    %17 = arith.subf %7, %16 : vector<128x1xf32>
    %cst_4 = arith.constant -7.500000e-01 : f32
    %18 = vector.broadcast %cst_4 : f32 to vector<128x1xf32>
    %19 = arith.mulf %18, %17 : vector<128x1xf32>
    %cst_5 = arith.constant 2.500000e-01 : f32
    %20 = vector.broadcast %cst_5 : f32 to vector<128x1xf32>
    %21 = arith.mulf %20, %17 : vector<128x1xf32>
    %22 = arith.maximumf %19, %21 : vector<128x1xf32>
    %23 = arith.addf %15, %22 : vector<128x1xf32>
    %24 = vector.extract_strided_slice %0 {offsets = [0, 3], sizes = [128, 1], strides = [1, 1]} : vector<128x5xf32> to vector<128x1xf32>
    %25 = arith.subf %6, %24 : vector<128x1xf32>
    %cst_6 = arith.constant -2.500000e-01 : f32
    %26 = vector.broadcast %cst_6 : f32 to vector<128x1xf32>
    %27 = arith.mulf %26, %25 : vector<128x1xf32>
    %cst_7 = arith.constant 7.500000e-01 : f32
    %28 = vector.broadcast %cst_7 : f32 to vector<128x1xf32>
    %29 = arith.mulf %28, %25 : vector<128x1xf32>
    %30 = arith.maximumf %27, %29 : vector<128x1xf32>
    %31 = arith.addf %23, %30 : vector<128x1xf32>
    %32 = vector.extract_strided_slice %0 {offsets = [0, 4], sizes = [128, 1], strides = [1, 1]} : vector<128x5xf32> to vector<128x1xf32>
    %33 = arith.subf %7, %32 : vector<128x1xf32>
    %cst_8 = arith.constant -2.500000e-01 : f32
    %34 = vector.broadcast %cst_8 : f32 to vector<128x1xf32>
    %35 = arith.mulf %34, %33 : vector<128x1xf32>
    %cst_9 = arith.constant 7.500000e-01 : f32
    %36 = vector.broadcast %cst_9 : f32 to vector<128x1xf32>
    %37 = arith.mulf %36, %33 : vector<128x1xf32>
    %38 = arith.maximumf %35, %37 : vector<128x1xf32>
    %39 = arith.addf %31, %38 : vector<128x1xf32>
    %c0_10 = arith.constant 0 : index
    %c0_11 = arith.constant 0 : index
    %40 = vector.load %arg3[%c0_10, %c0_11] : memref<128x1xf32, #tpu.memory_space<vmem>>, vector<128x1xf32>
    tpu.vector_store %arg3[%c0_10, %c0_11], %39 {strides = array<i32>} : memref<128x1xf32, #tpu.memory_space<vmem>>, vector<128x1xf32>,
    return
  }
  func.func @transform_0(%arg0: i32) -> (i32, i32) {
    %c0_i32 = arith.constant 0 : i32
    %c0_i32_0 = arith.constant 0 : i32
    return %arg0, %c0_i32 : i32, i32
  }
  func.func @transform_1(%arg0: i32) -> (i32, i32) {
    %c0_i32 = arith.constant 0 : i32
    %c0_i32_0 = arith.constant 0 : i32
    return %arg0, %c0_i32 : i32, i32
  }
  func.func @transform_2(%arg0: i32) -> (i32, i32) {
    %c0_i32 = arith.constant 0 : i32
    %c0_i32_0 = arith.constant 0 : i32
    return %arg0, %c0_i32 : i32, i32
  }
}

</mosaic_0001>

<bundles_post_ra>
// kernel: tpu_custom_call.1
= control target key start
LH: loop header
LB: loop body
LE: loop exit
PB: predicated region body
PF: predicated region fallthrough
CT: control target
= control target key end

     0   :  { %s1264_s9 = smov 0   ;;  %s1266_s10 = smov 0   ;;  %s1883_s0 = inlined_call_operand.vmem [shape: f32[300,5], index: 0, kind: input, shape index: {}]   ;;  %s1884_s1 = inlined_call_operand.vmem [shape: f32[300,3], index: 1, kind: input, shape index: {}]   ;;  %s1885_s2 = inlined_call_operand.vmem [shape: f32[300,1], index: 2, kind: output, shape index: {}]  }
   0x1   :  { %s1268_s11 = smov 0  }
   0x2 LB: > { %s1277_s12 = sadd.s32 4294967295, %s1213_s11   ;;  %s1279_s13 = sadd.s32 1, %s1213_s11   ;;  %s1213_s11 = sphi %s1268_s11, %s1916_s11   ;;  %s1209_s10 = sphi %s1266_s10, %s1915_s10   ;;  %s1205_s9 = sphi %s1264_s9, %s1914_s9  }
   0x3   : > { %s68_s14 = ssub.s32 %s1213_s11, %s1279_s13  ;;  %s71_s15 = sadd.s32 1, %s1209_s10 }
   0x4   : > { %p69_p0 = scmp.eq.s32.totalorder %s68_s14, 0  ;;  %p81_p1 = scmp.ne.s32.totalorder %s1209_s10, %s1205_s9 }
   0x5   : > { %p82_p2 = scmp.eq.s32.totalorder %s1277_s12, 2  ;;  %p1043_p3 = scmp.ge.s32.totalorder %s1213_s11, 1 }
   0x6   : > { %s1287_s16 = scalar_select %p69_p0, %s1209_s10, %s71_s15  }
   0x7   : > { %p1289_p4 = por %p82_p2, %p81_p1  ;;  %p140_p5 = scmp.lt.s32.totalorder %s1213_s11, 4 }
   0x9   : > { %p141_p6 = pnand %p1043_p3, %p140_p5 }
   0xb   : > { %144 = sbr.rel (%p141_p6) target bundleno = 408 (0x198), region = 28 }
  0x10   : > { %s1294_s18 = sshll.u32 %s1277_s12, 4  ;;  %s1247_s27 = smov 127   ;;  %vm735_vm0 = vcmask 7168  }
  0x11   : > { %p179_p7 = scmp.lt.s32.totalorder %s1294_s18, 37  ;;  %s1248_s28 = smov 126  }
  0x12   : > { %s171_s29 = sand.u32 1, %s1205_s9   ;;  %s760_s4 = ssub.s32 (%p1289_p4), 38, %s1294_s18 }
  0x13   : > { %s180_s19 = scalar_select %p179_p7, %s1294_s18, 37 }
  0x14   : > { %s1044_s30 = sshll.u32 %s171_s29, 7  ;;  %s1066_s5 = sshll.u32 (%p1289_p4), %s1277_s12, 7 }
  0x15   : > { %s1046_s20 = sshll.u32 %s180_s19, 3  ;;  %s1724_s3 = scalar_lea.vmem [#allocation2], %s1044_s30  }
  0x16   : > { %s1301_s23 = scalar_lea.vmem %s1883_s0, %s1046_s20  ;;  %s1306_s26 = scalar_lea.vmem %s1884_s1, %s1046_s20 }
  0x17   : > { %v1309_v0 = vld [vmem:[%s1301_s23 + $0x10] sm:$0xff]  ;;  %v1315_v2 = vld [vmem:[%s1301_s23] sm:$0xff]  ;;  %v1325_v5 = vld [vmem:[%s1301_s23 + $0x18] sm:$0xff]  ;;  %p761_p8 = scmp.lt.s32.totalorder (%p1289_p4), %s760_s4, 16  ;;  %s1790_s8 = scalar_lea.vmem (%p1289_p4), %s1885_s2, %s1066_s5  }
  0x18   : > { %v1312_v1 = vld [vmem:[%s1306_s26 + $0x10] sm:$0xff]  ;;  %v1322_v4 = vld [vmem:[%s1306_s26] sm:$0xff]  ;;  %v1328_v6 = vld [vmem:[%s1306_s26 + $0x18] sm:$0xff] }
  0x19   : > { %v1319_v3 = vsub.f32 %v1312_v1, %v1309_v0  ;;  %v1332_v7 = vsub.f32 %v1322_v4, %v1315_v2  ;;  %v1336_v8 = vsub.f32 %v1328_v6, %v1325_v5  ;;  %v1339_v9 = vld [vmem:[%s1301_s23 + $0x8] sm:$0xff]  ;;  %v1357_v16 = vld [vmem:[%s1301_s23 + $0x20] sm:$0xff]  ;;  %v1367_v22 = vld [vmem:[%s1301_s23 + $0x38] sm:$0xff] }
  0x1a   : > { %v1342_v10 = vld [vmem:[%s1306_s26 + $0x8] sm:$0xff]  ;;  %v1360_v17 = vld [vmem:[%s1306_s26 + $0x20] sm:$0xff]  ;;  %v1370_v23 = vld [vmem:[%s1306_s26 + $0x38] sm:$0xff] }
  0x1b   : > { %v1345_v11 = vld [vmem:[%s1301_s23 + $0x28] sm:$0xff]  ;;  %v273_v12 = vmul.f32 -0.75, %v1319_v3  ;;  %v289_v13 = vmul.f32 0.25, %v1319_v3  ;;  %v1351_v14 = vsub.f32 %v1342_v10, %v1339_v9  ;;  %v271_v18 = vmul.f32 -0.75, %v1332_v7  ;;  %1895 = vst [vmem:[#allocation3_spill] sm:$0xff] %v1370_v23  ;;  %v1381_v28 = vld [vmem:[%s1301_s23 + $0x30] sm:$0xff] }
  0x1c   : > { %v1354_v15 = vld [vmem:[%s1306_s26 + $0x28] sm:$0xff]  ;;  %v287_v19 = vmul.f32 0.25, %v1332_v7  ;;  %v274_v20 = vmul.f32 -0.75, %v1336_v8  ;;  %v290_v21 = vmul.f32 0.25, %v1336_v8  ;;  %v1384_v29 = vld [vmem:[%s1306_s26 + $0x30] sm:$0xff]  ;;  %v1390_v31 = vsub.f32 %v1360_v17, %v1357_v16  ;;  %v1419_v42 = vld [vmem:[%s1301_s23 + $0x40] sm:$0xff] }
  0x1d   : > { %v1372_v24 = vmax.f32 %v273_v12, %v289_v13  ;;  %v272_v25 = vmul.f32 -0.75, %v1351_v14  ;;  %v288_v26 = vmul.f32 0.25, %v1351_v14  ;;  %v1378_v27 = vsub.f32 %v1354_v15, %v1345_v11  ;;  %v1413_v40 = vld [vmem:[%s1301_s23 + $0x48] sm:$0xff]  ;;  %v1422_v43 = vld [vmem:[%s1306_s26 + $0x40] sm:$0xff]  ;;  %v1445_v52 = vld [vmem:[%s1301_s23 + $0x58] sm:$0xff] }
  0x1e   : > { %v1386_v30 = vmax.f32 %v271_v18, %v287_v19  ;;  %v1394_v32 = vmax.f32 %v274_v20, %v290_v21  ;;  %v1400_v35 = vsub.f32 %v1370_v23, %v1367_v22  ;;  %v275_v37 = vmul.f32 -0.75, %v1390_v31  ;;  %v1416_v41 = vld [vmem:[%s1306_s26 + $0x48] sm:$0xff]  ;;  %v1448_v53 = vld [vmem:[%s1306_s26 + $0x58] sm:$0xff]  ;;  %v1451_v54 = vld [vmem:[%s1301_s23 + $0x50] sm:$0xff] }
  0x1f   : > { %339 = vrot.lane.b32.xlu1 %v1372_v24, %s1247_s27  ;;  %v276_v33 = vmul.f32 -0.75, %v1378_v27  ;;  %v292_v34 = vmul.f32 0.25, %v1378_v27  ;;  %v1404_v36 = vmax.f32 %v272_v25, %v288_v26  ;;  %v291_v38 = vmul.f32 0.25, %v1390_v31  ;;  %1896 = vst [vmem:[#allocation4_spill] sm:$0xff] %v1416_v41  ;;  %1897 = vst [vmem:[#allocation5_spill] sm:$0xff] %v1448_v53  ;;  %v1454_v55 = vld [vmem:[%s1306_s26 + $0x50] sm:$0xff] }
  0x20   : > { %335 = vrot.lane.b32.xlu0 %v1386_v30, %s1247_s27  ;;  %v1410_v39 = vsub.f32 %v1384_v29, %v1381_v28  ;;  %v278_v45 = vmul.f32 -0.75, %v1400_v35  ;;  %v294_v46 = vmul.f32 0.25, %v1400_v35  ;;  %v1432_v47 = vsub.f32 %v1416_v41, %v1413_v40  ;;  %1898 = vst [vmem:[#allocation6_spill] sm:$0xff] %v1454_v55  ;;  %v220_v12 = vld [vmem:[%s1301_s23 + $0x68] sm:$0xff]  ;;  %v219_v18 = vld [vmem:[%s1301_s23 + $0x60] sm:$0xff] }
  0x21   : > { %v1426_v44 = vmax.f32 %v276_v33, %v292_v34  ;;  %v1436_v48 = vmax.f32 %v275_v37, %v291_v38  ;;  %v1442_v51 = vsub.f32 %v1422_v43, %v1419_v42  ;;  %v1464_v59 = vsub.f32 %v1448_v53, %v1445_v52  ;;  %v1478_v13 = vld [vmem:[%s1306_s26 + $0x68] sm:$0xff]  ;;  %v1482_v19 = vld [vmem:[%s1306_s26 + $0x60] sm:$0xff] }
  0x22   : > { %v277_v49 = vmul.f32 -0.75, %v1410_v39  ;;  %v293_v50 = vmul.f32 0.25, %v1410_v39  ;;  %v1458_v56 = vmax.f32 %v278_v45, %v294_v46  ;;  %v280_v57 = vmul.f32 -0.75, %v1432_v47  ;;  %1899 = vst [vmem:[#allocation7_spill] sm:$0xff] %v1478_v13  ;;  %1900 = vst [vmem:[#allocation8_spill] sm:$0xff] %v1482_v19  ;;  %v222_v45 = vld [vmem:[%s1301_s23 + $0x78] sm:$0xff] }
  0x23   : > { %341 = vrot.lane.b32.xlu1 %v1394_v32, %s1247_s27  ;;  %v296_v58 = vmul.f32 0.25, %v1432_v47  ;;  %v279_v61 = vmul.f32 -0.75, %v1442_v51  ;;  %v295_v62 = vmul.f32 0.25, %v1442_v51  ;;  %v1474_v63 = vsub.f32 %v1454_v55, %v1451_v54  ;;  %v1500_v46 = vld [vmem:[%s1306_s26 + $0x78] sm:$0xff] }
  0x24   : > { %337 = vrot.lane.b32.xlu0 %v1404_v36, %s1247_s27  ;;  %v1468_v60 = vmax.f32 %v277_v49, %v293_v50  ;;  %v282_v21 = vmul.f32 -0.75, %v1464_v59  ;;  %v298_v25 = vmul.f32 0.25, %v1464_v59  ;;  %v1489_v26 = vsub.f32 %v1478_v13, %v220_v12  ;;  %1901 = vst [vmem:[#allocation9_spill] sm:$0xff] %v1500_v46  ;;  %v221_v49 = vld [vmem:[%s1301_s23 + $0x70] sm:$0xff] }
  0x25   : > { %v312_v20 = vmax.f32 %v280_v57, %v296_v58  ;;  %v311_v33 = vmax.f32 %v279_v61, %v295_v62  ;;  %v281_v34 = vmul.f32 -0.75, %v1474_v63  ;;  %v297_v37 = vmul.f32 0.25, %v1474_v63  ;;  %v1504_v50 = vld [vmem:[%s1306_s26 + $0x70] sm:$0xff] }
  0x26   : > { %v1496_v38 = vsub.f32 %v1482_v19, %v219_v18  ;;  %1902 = vst [vmem:[#allocation10_spill] sm:$0xff] %v1504_v50  ;;  %v314_v57 = vmax.f32 %v282_v21, %v298_v25  ;;  %v284_v58 = vmul.f32 -0.75, %v1489_v26  ;;  %v300_v61 = vmul.f32 0.25, %v1489_v26 }
  0x27   : > { %345 = vrot.lane.b32.xlu1 %v1426_v44, %s1247_s27  ;;  %v1510_v62 = vsub.f32 %v1500_v46, %v222_v45  ;;  %v313_v13 = vmax.f32 %v281_v34, %v297_v37  ;;  %v1516_v41 = vsub.f32 %v1504_v50, %v221_v49 }
  0x28   : > { %343 = vrot.lane.b32.xlu0 %v1436_v48, %s1247_s27  ;;  %v283_v53 = vmul.f32 -0.75, %v1496_v38  ;;  %v299_v19 = vmul.f32 0.25, %v1496_v38  ;;  %v316_v21 = vmax.f32 %v284_v58, %v300_v61 }
  0x29   : > { %v286_v25 = vmul.f32 -0.75, %v1510_v62  ;;  %v302_v55 = vmul.f32 0.25, %v1510_v62  ;;  %v285_v23 = vmul.f32 -0.75, %v1516_v41  ;;  %v301_v34 = vmul.f32 0.25, %v1516_v41 }
  0x2a   : > { %v315_v46 = vmax.f32 %v283_v53, %v299_v19 }
  0x2b   : > { %349 = vrot.lane.b32.xlu1 %v1458_v56, %s1247_s27  ;;  %v318_v37 = vmax.f32 %v286_v25, %v302_v55  ;;  %v317_v50 = vmax.f32 %v285_v23, %v301_v34  ;;  %v256_v23 = vand.u32 2147483647, %v1351_v14  ;;  %v261_v14 = vand.u32 2147483647, %v1410_v39 }
  0x2c   : > { %347 = vrot.lane.b32.xlu0 %v1468_v60, %s1247_s27  ;;  %v265_v39 = vand.u32 2147483647, %v1474_v63  ;;  %v269_v63 = vand.u32 2147483647, %v1516_v41 }
  0x2f   : > { %353 = vrot.lane.b32.xlu1 %v312_v20, %s1247_s27 }
  0x30   : > { %351 = vrot.lane.b32.xlu0 %v311_v33, %s1247_s27 }
  0x33   : > { %357 = vrot.lane.b32.xlu1 %v314_v57, %s1247_s27 }
  0x34   : > { %355 = vrot.lane.b32.xlu0 %v313_v13, %s1247_s27 }
  0x37   : > { %361 = vrot.lane.b32.xlu1 %v316_v21, %s1247_s27 }
  0x38   : > { %359 = vrot.lane.b32.xlu0 %v315_v46, %s1247_s27 }
  0x3b   : > { %365 = vrot.lane.b32.xlu1 %v318_v37, %s1247_s27 }
  0x3c   : > { %363 = vrot.lane.b32.xlu0 %v317_v50, %s1247_s27 }
  0x3f   : > { %479 = vrot.lane.b32.xlu1 %v1315_v2, %s1248_s28  ;;  %v255_v2 = vand.u32 2147483647, %v1332_v7 }
  0x40   : > { %399 = vrot.lane.b32.xlu0 %v1386_v30, %s1248_s28 }
  0x43   : > { %483 = vrot.lane.b32.xlu1 %v1309_v0, %s1248_s28  ;;  %v257_v0 = vand.u32 2147483647, %v1319_v3  ;;  %v259_v3 = vand.u32 2147483647, %v1390_v31  ;;  %v263_v31 = vand.u32 2147483647, %v1442_v51 }
  0x44   : > { %481 = vrot.lane.b32.xlu0 %v1339_v9, %s1248_s28  ;;  %v267_v51 = vand.u32 2147483647, %v1496_v38 }
  0x47   : > { %487 = vrot.lane.b32.xlu1 %v1357_v16, %s1248_s28  ;;  %v258_v16 = vand.u32 2147483647, %v1336_v8 }
  0x48   : > { %485 = vrot.lane.b32.xlu0 %v1325_v5, %s1248_s28 }
  0x4b   : > { %491 = vrot.lane.b32.xlu1 %v1381_v28, %s1248_s28 }
  0x4c   : > { %489 = vrot.lane.b32.xlu0 %v1345_v11, %s1248_s28 }
  0x4f   : > { %495 = vrot.lane.b32.xlu1 %v1419_v42, %s1248_s28 }
  0x50   : > { %493 = vrot.lane.b32.xlu0 %v1367_v22, %s1248_s28 }
  0x53   : > { %499 = vrot.lane.b32.xlu1 %v1451_v54, %s1248_s28 }
  0x54   : > { %497 = vrot.lane.b32.xlu0 %v1413_v40, %s1248_s28 }
  0x57   : > { %503 = vrot.lane.b32.xlu1 %v219_v18, %s1248_s28 }
  0x58   : > { %501 = vrot.lane.b32.xlu0 %v1445_v52, %s1248_s28 }
  0x5b   : > { %507 = vrot.lane.b32.xlu1 %v221_v49, %s1248_s28 }
  0x5c   : > { %505 = vrot.lane.b32.xlu0 %v220_v12, %s1248_s28 }
  0x5f   : > { %401 = vrot.lane.b32.xlu1 %v1404_v36, %s1248_s28 }
  0x60   : > { %509 = vrot.lane.b32.xlu0 %v222_v45, %s1248_s28 }
  0x63   : > { %405 = vrot.lane.b32.xlu1 %v1394_v32, %s1248_s28  ;;  %v260_v32 = vand.u32 2147483647, %v1378_v27  ;;  %v264_v27 = vand.u32 2147483647, %v1432_v47  ;;  %v268_v47 = vand.u32 2147483647, %v1489_v26 }
  0x64   : > { %403 = vrot.lane.b32.xlu0 %v1372_v24, %s1248_s28 }
  0x67   : > { %409 = vrot.lane.b32.xlu1 %v1426_v44, %s1248_s28  ;;  %v262_v44 = vand.u32 2147483647, %v1400_v35  ;;  %v266_v35 = vand.u32 2147483647, %v1464_v59  ;;  %v270_v59 = vand.u32 2147483647, %v1510_v62 }
  0x68   : > { %407 = vrot.lane.b32.xlu0 %v1436_v48, %s1248_s28 }
  0x6b   : > { %413 = vrot.lane.b32.xlu1 %v1458_v56, %s1248_s28 }
  0x6c   : > { %411 = vrot.lane.b32.xlu0 %v1468_v60, %s1248_s28 }
  0x6f   : > { %417 = vrot.lane.b32.xlu1 %v312_v20, %s1248_s28 }
  0x70   : > { %415 = vrot.lane.b32.xlu0 %v311_v33, %s1248_s28 }
  0x73   : > { %421 = vrot.lane.b32.xlu1 %v314_v57, %s1248_s28 }
  0x74   : > { %419 = vrot.lane.b32.xlu0 %v313_v13, %s1248_s28 }
  0x77   : > { %425 = vrot.lane.b32.xlu1 %v316_v21, %s1248_s28 }
  0x78   : > { %423 = vrot.lane.b32.xlu0 %v315_v46, %s1248_s28 }
  0x7b   : > { %429 = vrot.lane.b32.xlu1 %v318_v37, %s1248_s28 }
  0x7c   : > { %427 = vrot.lane.b32.xlu0 %v317_v50, %s1248_s28 }
  0x91   : > { %v340_v5 = vpop.permute.xlu1 %339 }
  0x92   : > { %v1582_v9 = vadd.f32 %v340_v5, %v257_v0  ;;  %v336_v11 = vpop.permute.xlu0 %335 }
  0x93   : > { %v383_v22 = vadd.f32 %v336_v11, %v255_v2 }
  0x95   : > { %v342_v24 = vpop.permute.xlu1 %341 }
  0x96   : > { %v1586_v28 = vadd.f32 %v342_v24, %v258_v16  ;;  %v338_v30 = vpop.permute.xlu0 %337 }
  0x97   : > { %v1589_v36 = vadd.f32 %v338_v30, %v256_v23 }
  0x99   : > { %v346_v7 = vpop.permute.xlu1 %345 }
  0x9a   : > { %v1592_v40 = vadd.f32 %v346_v7, %v260_v32  ;;  %v344_v42 = vpop.permute.xlu0 %343 }
  0x9b   : > { %v1595_v8 = vadd.f32 %v344_v42, %v259_v3 }
  0x9d   : > { %v350_v48 = vpop.permute.xlu1 %349 }
  0x9e   : > { %v1598_v52 = vadd.f32 %v350_v48, %v262_v44  ;;  %v348_v53 = vpop.permute.xlu0 %347 }
  0x9f   : > { %v1601_v54 = vadd.f32 %v348_v53, %v261_v14 }
  0xa1   : > { %v354_v55 = vpop.permute.xlu1 %353 }
  0xa2   : > { %v1604_v56 = vadd.f32 %v354_v55, %v264_v27  ;;  %v352_v60 = vpop.permute.xlu0 %351 }
  0xa3   : > { %v1607_v12 = vadd.f32 %v352_v60, %v263_v31 }
  0xa5   : > { %v358_v13 = vpop.permute.xlu1 %357 }
  0xa6   : > { %v1610_v18 = vadd.f32 %v358_v13, %v266_v35  ;;  %v356_v19 = vpop.permute.xlu0 %355 }
  0xa7   : > { %v1613_v20 = vadd.f32 %v356_v19, %v265_v39 }
  0xa9   : > { %v362_v33 = vpop.permute.xlu1 %361 }
  0xaa   : > { %v1616_v45 = vadd.f32 %v362_v33, %v268_v47  ;;  %v360_v46 = vpop.permute.xlu0 %359  ;;  %v1903_v47 = vld [vmem:[#allocation3_spill] sm:$0xff] }
  0xab   : > { %v1619_v49 = vadd.f32 %v360_v46, %v267_v51 }
  0xad   : > { %v366_v50 = vpop.permute.xlu1 %365 }
  0xae   : > { %v1622_v57 = vadd.f32 %v366_v50, %v270_v59  ;;  %v364_v58 = vpop.permute.xlu0 %363 }
  0xaf   : > { %v1624_v61 = vadd.f32 %v364_v58, %v269_v63  ;;  %v1904_v58 = vld [vmem:[#allocation6_spill] sm:$0xff] }
  0xb1   : > { %v480_v26 = vpop.permute.xlu1 %479 }
  0xb2   : > { %v527_v21 = vsub.f32 %v1322_v4, %v480_v26  ;;  %v400_v38 = vpop.permute.xlu0 %399 }
  0xb3   : > { %v1627_v25 = vadd.f32 %v400_v38, %v383_v22 }
  0xb4   : > { %v543_v34 = vmul.f32 -0.25, %v527_v21  ;;  %v559_v37 = vmul.f32 0.75, %v527_v21 }
  0xb5   : > { %v484_v0 = vpop.permute.xlu1 %483 }
  0xb6   : > { %v529_v62 = vsub.f32 %v1312_v1, %v484_v0  ;;  %v482_v2 = vpop.permute.xlu0 %481  ;;  %v1630_v5 = vmax.f32 %v543_v34, %v559_v37  ;;  %v1905_v34 = vld [vmem:[#allocation4_spill] sm:$0xff] }
  0xb7   : > { %v528_v41 = vsub.f32 %v1342_v10, %v482_v2 }
  0xb8   : > { %v545_v11 = vmul.f32 -0.25, %v529_v62  ;;  %v561_v16 = vmul.f32 0.75, %v529_v62  ;;  %607 = vrot.lane.b32.xlu0 %v1630_v5, %s1247_s27 }
  0xb9   : > { %v544_v23 = vmul.f32 -0.25, %v528_v41  ;;  %v560_v4 = vmul.f32 0.75, %v528_v41  ;;  %v488_v24 = vpop.permute.xlu1 %487 }
  0xba   : > { %v531_v22 = vsub.f32 %v1360_v17, %v488_v24  ;;  %v486_v30 = vpop.permute.xlu0 %485  ;;  %v1636_v32 = vmax.f32 %v545_v11, %v561_v16  ;;  %v1906_v16 = vld [vmem:[#allocation8_spill] sm:$0xff] }
  0xbb   : > { %v530_v1 = vsub.f32 %v1328_v6, %v486_v30  ;;  %v1639_v3 = vmax.f32 %v544_v23, %v560_v4 }
  0xbc   : > { %v547_v7 = vmul.f32 -0.25, %v531_v22  ;;  %v563_v42 = vmul.f32 0.75, %v531_v22  ;;  %611 = vrot.lane.b32.xlu0 %v1636_v32, %s1247_s27  ;;  %v1907_v22 = vld [vmem:[#allocation5_spill] sm:$0xff] }
  0xbd   : > { %v546_v10 = vmul.f32 -0.25, %v530_v1  ;;  %v562_v44 = vmul.f32 0.75, %v530_v1  ;;  %609 = vrot.lane.b32.xlu1 %v1639_v3, %s1247_s27  ;;  %v492_v14 = vpop.permute.xlu1 %491 }
  0xbe   : > { %v533_v17 = vsub.f32 %v1384_v29, %v492_v14  ;;  %v490_v48 = vpop.permute.xlu0 %489  ;;  %v1646_v53 = vmax.f32 %v547_v7, %v563_v42 }
  0xbf   : > { %v532_v6 = vsub.f32 %v1354_v15, %v490_v48  ;;  %v1649_v27 = vmax.f32 %v546_v10, %v562_v44 }
  0xc0   : > { %v549_v31 = vmul.f32 -0.25, %v533_v17  ;;  %v565_v55 = vmul.f32 0.75, %v533_v17  ;;  %615 = vrot.lane.b32.xlu0 %v1646_v53, %s1247_s27  ;;  %v1908_v17 = vld [vmem:[#allocation10_spill] sm:$0xff] }
  0xc1   : > { %v548_v60 = vmul.f32 -0.25, %v532_v6  ;;  %v564_v35 = vmul.f32 0.75, %v532_v6  ;;  %613 = vrot.lane.b32.xlu1 %v1649_v27, %s1247_s27  ;;  %v496_v39 = vpop.permute.xlu1 %495 }
  0xc2   : > { %v535_v29 = vsub.f32 %v1422_v43, %v496_v39  ;;  %v494_v13 = vpop.permute.xlu0 %493  ;;  %v581_v19 = vmax.f32 %v549_v31, %v565_v55  ;;  %v1909_v55 = vld [vmem:[#allocation7_spill] sm:$0xff] }
  0xc3   : > { %v534_v51 = vsub.f32 %v1903_v47, %v494_v13  ;;  %v580_v15 = vmax.f32 %v548_v60, %v564_v35 }
  0xc4   : > { %v551_v33 = vmul.f32 -0.25, %v535_v29  ;;  %v567_v46 = vmul.f32 0.75, %v535_v29  ;;  %619 = vrot.lane.b32.xlu0 %v581_v19, %s1247_s27 }
  0xc5   : > { %v550_v59 = vmul.f32 -0.25, %v534_v51  ;;  %v566_v63 = vmul.f32 0.75, %v534_v51  ;;  %617 = vrot.lane.b32.xlu1 %v580_v15, %s1247_s27  ;;  %v500_v50 = vpop.permute.xlu1 %499 }
  0xc6   : > { %v537_v26 = vsub.f32 %v1904_v58, %v500_v50  ;;  %v498_v21 = vpop.permute.xlu0 %497  ;;  %v583_v38 = vmax.f32 %v551_v33, %v567_v46  ;;  %v1910_v46 = vld [vmem:[#allocation9_spill] sm:$0xff] }
  0xc7   : > { %v536_v43 = vsub.f32 %v1905_v34, %v498_v21  ;;  %v582_v37 = vmax.f32 %v550_v59, %v566_v63 }
  0xc8   : > { %v553_v0 = vmul.f32 -0.25, %v537_v26  ;;  %v569_v62 = vmul.f32 0.75, %v537_v26  ;;  %623 = vrot.lane.b32.xlu0 %v583_v38, %s1247_s27 }
  0xc9   : > { %v552_v2 = vmul.f32 -0.25, %v536_v43  ;;  %v568_v41 = vmul.f32 0.75, %v536_v43  ;;  %621 = vrot.lane.b32.xlu1 %v582_v37, %s1247_s27  ;;  %v504_v11 = vpop.permute.xlu1 %503 }
  0xca   : > { %v539_v23 = vsub.f32 %v1906_v16, %v504_v11  ;;  %v502_v4 = vpop.permute.xlu0 %501  ;;  %v585_v24 = vmax.f32 %v553_v0, %v569_v62 }
  0xcb   : > { %v538_v30 = vsub.f32 %v1907_v22, %v502_v4  ;;  %v584_v1 = vmax.f32 %v552_v2, %v568_v41 }
  0xcc   : > { %v555_v7 = vmul.f32 -0.25, %v539_v23  ;;  %v571_v42 = vmul.f32 0.75, %v539_v23  ;;  %627 = vrot.lane.b32.xlu0 %v585_v24, %s1247_s27 }
  0xcd   : > { %v554_v10 = vmul.f32 -0.25, %v538_v30  ;;  %v570_v44 = vmul.f32 0.75, %v538_v30  ;;  %625 = vrot.lane.b32.xlu1 %v584_v1, %s1247_s27  ;;  %v508_v14 = vpop.permute.xlu1 %507 }
  0xce   : > { %v541_v48 = vsub.f32 %v1908_v17, %v508_v14  ;;  %v506_v6 = vpop.permute.xlu0 %505  ;;  %v587_v31 = vmax.f32 %v555_v7, %v571_v42 }
  0xcf   : > { %v540_v60 = vsub.f32 %v1909_v55, %v506_v6  ;;  %v586_v35 = vmax.f32 %v554_v10, %v570_v44 }
  0xd0   : > { %v557_v39 = vmul.f32 -0.25, %v541_v48  ;;  %v573_v29 = vmul.f32 0.75, %v541_v48  ;;  %631 = vrot.lane.b32.xlu0 %v587_v31, %s1247_s27 }
  0xd1   : > { %v556_v13 = vmul.f32 -0.25, %v540_v60  ;;  %v572_v47 = vmul.f32 0.75, %v540_v60  ;;  %629 = vrot.lane.b32.xlu1 %v586_v35, %s1247_s27 }
  0xd2   : > { %v510_v51 = vpop.permute.xlu0 %509  ;;  %v589_v33 = vmax.f32 %v557_v39, %v573_v29 }
  0xd3   : > { %v542_v59 = vsub.f32 %v1910_v46, %v510_v51  ;;  %v588_v63 = vmax.f32 %v556_v13, %v572_v47 }
  0xd4   : > { %635 = vrot.lane.b32.xlu0 %v589_v33, %s1247_s27 }
  0xd5   : > { %v558_v50 = vmul.f32 -0.25, %v542_v59  ;;  %v574_v58 = vmul.f32 0.75, %v542_v59  ;;  %633 = vrot.lane.b32.xlu1 %v588_v63, %s1247_s27 }
  0xd7   : > { %v590_v26 = vmax.f32 %v558_v50, %v574_v58 }
  0xd8   : > { %671 = vrot.lane.b32.xlu0 %v1630_v5, %s1248_s28  ;;  %v402_v5 = vpop.permute.xlu1 %401 }
  0xd9   : > { %637 = vrot.lane.b32.xlu1 %v590_v26, %s1247_s27 }
  0xdc   : > { %675 = vrot.lane.b32.xlu0 %v1636_v32, %s1248_s28  ;;  %v404_v32 = vpop.permute.xlu0 %403 }
  0xdd   : > { %673 = vrot.lane.b32.xlu1 %v1639_v3, %s1248_s28  ;;  %v406_v3 = vpop.permute.xlu1 %405 }
  0xde   : > { %v450_v51 = vadd.f32 %v406_v3, %v1586_v28 }
  0xe0   : > { %679 = vrot.lane.b32.xlu0 %v1646_v53, %s1248_s28  ;;  %v408_v53 = vpop.permute.xlu0 %407 }
  0xe1   : > { %677 = vrot.lane.b32.xlu1 %v1649_v27, %s1248_s28  ;;  %v410_v27 = vpop.permute.xlu1 %409 }
  0xe4   : > { %683 = vrot.lane.b32.xlu0 %v581_v19, %s1248_s28  ;;  %v412_v19 = vpop.permute.xlu0 %411 }
  0xe5   : > { %681 = vrot.lane.b32.xlu1 %v580_v15, %s1248_s28  ;;  %v414_v15 = vpop.permute.xlu1 %413 }
  0xe8   : > { %687 = vrot.lane.b32.xlu0 %v583_v38, %s1248_s28  ;;  %v416_v21 = vpop.permute.xlu0 %415 }
  0xe9   : > { %685 = vrot.lane.b32.xlu1 %v582_v37, %s1248_s28  ;;  %v1696_v38 = vpop.permute.xlu1 %417  ;;  %v455_v3 = vadd.f32 %v416_v21, %v1607_v12 }
  0xea   : > { %v456_v21 = vadd.f32 %v1696_v38, %v1604_v56 }
  0xec   : > { %691 = vrot.lane.b32.xlu0 %v585_v24, %s1248_s28  ;;  %v1698_v34 = vpop.permute.xlu0 %419 }
  0xed   : > { %689 = vrot.lane.b32.xlu1 %v584_v1, %s1248_s28  ;;  %v1700_v43 = vpop.permute.xlu1 %421 }
  0xf0   : > { %695 = vrot.lane.b32.xlu0 %v587_v31, %s1248_s28  ;;  %v1702_v37 = vpop.permute.xlu0 %423  ;;  %v449_v31 = vadd.f32 %v404_v32, %v1582_v9 }
  0xf1   : > { %693 = vrot.lane.b32.xlu1 %v586_v35, %s1248_s28  ;;  %v1704_v0 = vpop.permute.xlu1 %425  ;;  %v448_v35 = vadd.f32 %v402_v5, %v1589_v36 }
  0xf4   : > { %699 = vrot.lane.b32.xlu0 %v589_v33, %s1248_s28  ;;  %v1706_v62 = vpop.permute.xlu0 %427 }
  0xf5   : > { %697 = vrot.lane.b32.xlu1 %v588_v63, %s1248_s28  ;;  %v1708_v41 = vpop.permute.xlu1 %429  ;;  %v453_v63 = vadd.f32 %v412_v19, %v1601_v54  ;;  %v454_v54 = vadd.f32 %v414_v15, %v1598_v52 }
  0xf9   : > { %701 = vrot.lane.b32.xlu1 %v590_v26, %s1248_s28 }
 0x12a   : > { %v608_v2 = vpop.permute.xlu0 %607 }
 0x12b   : > { %v655_v48 = vadd.f32 %v608_v2, %v1627_v25  ;;  %v451_v25 = vadd.f32 %v408_v53, %v1595_v8  ;;  %v452_v8 = vadd.f32 %v410_v27, %v1592_v40 }
 0x12e   : > { %v612_v11 = vpop.permute.xlu0 %611 }
 0x12f   : > { %v610_v16 = vpop.permute.xlu1 %609  ;;  %v657_v39 = vadd.f32 %v612_v11, %v449_v31 }
 0x130   : > { %v656_v29 = vadd.f32 %v610_v16, %v448_v35  ;;  %v457_v16 = vadd.f32 %v1698_v34, %v1613_v20 }
 0x132   : > { %v616_v23 = vpop.permute.xlu0 %615 }
 0x133   : > { %v614_v4 = vpop.permute.xlu1 %613  ;;  %v659_v36 = vadd.f32 %v616_v23, %v451_v25 }
 0x134   : > { %v658_v46 = vadd.f32 %v614_v4, %v450_v51 }
 0x136   : > { %v620_v24 = vpop.permute.xlu0 %619 }
 0x137   : > { %v618_v22 = vpop.permute.xlu1 %617  ;;  %v661_v5 = vadd.f32 %v620_v24, %v453_v63 }
 0x138   : > { %v660_v28 = vadd.f32 %v618_v22, %v452_v8  ;;  %v459_v22 = vadd.f32 %v1702_v37, %v1619_v49  ;;  %v461_v49 = vadd.f32 %v1706_v62, %v1624_v61  ;;  %v462_v61 = vadd.f32 %v1708_v41, %v1622_v57 }
 0x13a   : > { %v624_v30 = vpop.permute.xlu0 %623 }
 0x13b   : > { %v622_v1 = vpop.permute.xlu1 %621  ;;  %v663_v11 = vadd.f32 %v624_v30, %v455_v3  ;;  %v458_v30 = vadd.f32 %v1700_v43, %v1610_v18  ;;  %v460_v18 = vadd.f32 %v1704_v0, %v1616_v45 }
 0x13c   : > { %v662_v40 = vadd.f32 %v622_v1, %v454_v54 }
 0x13e   : > { %v628_v7 = vpop.permute.xlu0 %627 }
 0x13f   : > { %v626_v42 = vpop.permute.xlu1 %625  ;;  %v665_v52 = vadd.f32 %v628_v7, %v457_v16 }
 0x140   : > { %v664_v15 = vadd.f32 %v626_v42, %v456_v21 }
 0x142   : > { %v1710_v10 = vpop.permute.xlu0 %631 }
 0x143   : > { %v1712_v44 = vpop.permute.xlu1 %629  ;;  %v667_v56 = vadd.f32 %v1710_v10, %v459_v22 }
 0x144   : > { %v666_v38 = vadd.f32 %v1712_v44, %v458_v30 }
 0x146   : > { %v1715_v14 = vpop.permute.xlu0 %635 }
 0x147   : > { %v1717_v17 = vpop.permute.xlu1 %633  ;;  %v669_v10 = vadd.f32 %v1715_v14, %v461_v49 }
 0x148   : > { %v668_v44 = vadd.f32 %v1717_v17, %v460_v18 }
 0x14a   : > { %v672_v6 = vpop.permute.xlu0 %671 }
 0x14b   : > { %v1721_v55 = vpop.permute.xlu1 %637  ;;  %v719_v60 = vadd.f32 %v672_v6, %v655_v48 }
 0x14c   : > { %v670_v45 = vadd.f32 %v1721_v55, %v462_v61 }
 0x14d   : > { %736 = vst.msk [vmem:[%s1724_s3] sm:$0xff] %vm735_vm0, %v719_v60 }
 0x14e   : > { %v676_v13 = vpop.permute.xlu0 %675 }
 0x14f   : > { %v674_v47 = vpop.permute.xlu1 %673  ;;  %v721_v9 = vadd.f32 %v676_v13, %v657_v39 }
 0x150   : > { %v720_v33 = vadd.f32 %v674_v47, %v656_v29 }
 0x151   : > { %738 = vst.msk [vmem:[%s1724_s3 + $0x10] sm:$0xff] %vm735_vm0, %v721_v9 }
 0x152   : > { %737 = vst.msk [vmem:[%s1724_s3 + $0x8] sm:$0xff] %vm735_vm0, %v720_v33  ;;  %v680_v59 = vpop.permute.xlu0 %679 }
 0x153   : > { %v678_v50 = vpop.permute.xlu1 %677  ;;  %v723_v58 = vadd.f32 %v680_v59, %v659_v36 }
 0x154   : > { %v722_v26 = vadd.f32 %v678_v50, %v658_v46 }
 0x155   : > { %740 = vst.msk [vmem:[%s1724_s3 + $0x20] sm:$0xff] %vm735_vm0, %v723_v58 }
 0x156   : > { %739 = vst.msk [vmem:[%s1724_s3 + $0x18] sm:$0xff] %vm735_vm0, %v722_v26  ;;  %v684_v32 = vpop.permute.xlu0 %683 }
 0x157   : > { %v682_v53 = vpop.permute.xlu1 %681  ;;  %v725_v2 = vadd.f32 %v684_v32, %v661_v5 }
 0x158   : > { %v724_v19 = vadd.f32 %v682_v53, %v660_v28 }
 0x159   : > { %742 = vst.msk [vmem:[%s1724_s3 + $0x30] sm:$0xff] %vm735_vm0, %v725_v2 }
 0x15a   : > { %741 = vst.msk [vmem:[%s1724_s3 + $0x28] sm:$0xff] %vm735_vm0, %v724_v19  ;;  %v688_v27 = vpop.permute.xlu0 %687 }
 0x15b   : > { %v686_v23 = vpop.permute.xlu1 %685  ;;  %v727_v12 = vadd.f32 %v688_v27, %v663_v11 }
 0x15c   : > { %v726_v4 = vadd.f32 %v686_v23, %v662_v40 }
 0x15d   : > { %744 = vst.msk [vmem:[%s1724_s3 + $0x40] sm:$0xff] %vm735_vm0, %v727_v12 }
 0x15e   : > { %743 = vst.msk [vmem:[%s1724_s3 + $0x38] sm:$0xff] %vm735_vm0, %v726_v4  ;;  %v692_v24 = vpop.permute.xlu0 %691 }
 0x15f   : > { %v690_v20 = vpop.permute.xlu1 %689  ;;  %v729_v34 = vadd.f32 %v692_v24, %v665_v52 }
 0x160   : > { %v728_v1 = vadd.f32 %v690_v20, %v664_v15 }
 0x161   : > { %746 = vst.msk [vmem:[%s1724_s3 + $0x50] sm:$0xff] %vm735_vm0, %v729_v34 }
 0x162   : > { %745 = vst.msk [vmem:[%s1724_s3 + $0x48] sm:$0xff] %vm735_vm0, %v728_v1  ;;  %v696_v7 = vpop.permute.xlu0 %695 }
 0x163   : > { %v694_v37 = vpop.permute.xlu1 %693  ;;  %v731_v42 = vadd.f32 %v696_v7, %v667_v56 }
 0x164   : > { %v730_v43 = vadd.f32 %v694_v37, %v666_v38 }
 0x165   : > { %748 = vst.msk [vmem:[%s1724_s3 + $0x60] sm:$0xff] %vm735_vm0, %v731_v42 }
 0x166   : > { %747 = vst.msk [vmem:[%s1724_s3 + $0x58] sm:$0xff] %vm735_vm0, %v730_v43  ;;  %v700_v48 = vpop.permute.xlu0 %699 }
 0x167   : > { %v698_v6 = vpop.permute.xlu1 %697  ;;  %v733_v31 = vadd.f32 %v700_v48, %v669_v10 }
 0x168   : > { %v732_v62 = vadd.f32 %v698_v6, %v668_v44 }
 0x169   : > { %750 = vst.msk [vmem:[%s1724_s3 + $0x70] sm:$0xff] %vm735_vm0, %v733_v31 }
 0x16a   : > { %749 = vst.msk [vmem:[%s1724_s3 + $0x68] sm:$0xff] %vm735_vm0, %v732_v62  ;;  %758 = sbr.rel (!%p1289_p4) target bundleno = 408 (0x198), region = 32 }
 0x16b   : > { %v702_v0 = vpop.permute.xlu1 %701 }
 0x16c   : > { %v734_v14 = vadd.f32 %v702_v0, %v670_v45 }
 0x16e   : > { %751 = vst.msk [vmem:[%s1724_s3 + $0x78] sm:$0xff] %vm735_vm0, %v734_v14 }
 0x16f   : > { %s1918_s4 = smov (!%p761_p8, %s760_s4), 16 }
 0x170   : > { %s1051_s9 = sshll.u32 %s1918_s4, 7 }
 0x171   : > { %p1054_p9 = scmp.eq.s32.totalorder %s1051_s9, 0 }
 0x172   : > { %s1796_s11 = sshrl.u32 (!%p1054_p9), %s1918_s4, 4 }
 0x173   : > { %769 = sbr.rel (%p1054_p9) target bundleno = 408 (0x198), region = 36  ;;  %p1055_p10 = scmp.le.s32.totalorder (!%p1054_p9), %s1796_s11, 0 }
 0x178   : > { %990 = sbr.rel (%p1055_p10) target bundleno = 391 (0x187), region = 115  ;;  %s1911_s12 = smov (!%p1055_p10), %s1790_s8 }
 0x179   : > { %s1912_s14 = smov (!%p1055_p10), %s1724_s3  ;;  %s1805_s15 = smov (!%p1055_p10), 0  }
 0x17a   : > { %s1807_s17 = smov (!%p1055_p10), 0  }
 0x17d LB: >> { %v862_v57 = vld [vmem:[%s1221_s14] sm:$0xff]  ;;  %v864_v41 = vld [vmem:[%s1221_s14 + $0x8] sm:$0xff]  ;;  %v866_v17 = vld [vmem:[%s1221_s14 + $0x10] sm:$0xff]  ;;  %s894_s18 = sadd.s32 1, %s1225_s15  ;;  %s856_s17 = sadd.s32 1, %s1229_s17   ;;  %s1229_s17 = sphi %s1807_s17, %s856_s17   ;;  %s1225_s15 = sphi %s1805_s15, %s1913_s15   ;;  %s1221_s14 = sphi %s1912_s14, %s899_s14   ;;  %s1217_s12 = sphi %s1911_s12, %s900_s12  }
 0x17e   : >> { %863 = vst [vmem:[%s1217_s12] sm:$0xff] %v862_v57  ;;  %865 = vst [vmem:[%s1217_s12 + $0x8] sm:$0xff] %v864_v41  ;;  %v868_v55 = vld [vmem:[%s1221_s14 + $0x18] sm:$0xff]  ;;  %v870_v60 = vld [vmem:[%s1221_s14 + $0x20] sm:$0xff]  ;;  %p895_p11 = scmp.ge.s32.totalorder %s894_s18, %s1796_s11  ;;  %p855_p12 = scmp.ge.s32.totalorder %s856_s17, %s1796_s11 }
 0x17f   : >> { %867 = vst [vmem:[%s1217_s12 + $0x10] sm:$0xff] %v866_v17  ;;  %v872_v35 = vld [vmem:[%s1221_s14 + $0x28] sm:$0xff]  ;;  %869 = vst [vmem:[%s1217_s12 + $0x18] sm:$0xff] %v868_v55  ;;  %v874_v39 = vld [vmem:[%s1221_s14 + $0x30] sm:$0xff] }
 0x180   : >> { %871 = vst [vmem:[%s1217_s12 + $0x20] sm:$0xff] %v870_v60  ;;  %873 = vst [vmem:[%s1217_s12 + $0x28] sm:$0xff] %v872_v35  ;;  %v876_v29 = vld [vmem:[%s1221_s14 + $0x38] sm:$0xff]  ;;  %v878_v13 = vld [vmem:[%s1221_s14 + $0x40] sm:$0xff]  ;;  %s1920_s18 = smov (%p895_p11, %s894_s18), 0 }
 0x181   : >> { %875 = vst [vmem:[%s1217_s12 + $0x30] sm:$0xff] %v874_v39  ;;  %877 = vst [vmem:[%s1217_s12 + $0x38] sm:$0xff] %v876_v29  ;;  %v880_v25 = vld [vmem:[%s1221_s14 + $0x48] sm:$0xff]  ;;  %v882_v47 = vld [vmem:[%s1221_s14 + $0x50] sm:$0xff]  ;;  %s1056_s19 = sshll.u32 %s1920_s18, 7  ;;  %s1913_s15 = smov %s1920_s18 }
 0x182   : >> { %879 = vst [vmem:[%s1217_s12 + $0x40] sm:$0xff] %v878_v13  ;;  %v884_v9 = vld [vmem:[%s1221_s14 + $0x58] sm:$0xff]  ;;  %881 = vst [vmem:[%s1217_s12 + $0x48] sm:$0xff] %v880_v25  ;;  %v886_v51 = vld [vmem:[%s1221_s14 + $0x60] sm:$0xff]  ;;  %858 = sbr.rel (!%p855_p12) target bundleno = 381 (0x17d), region = 121 }
 0x183   : >> { %883 = vst [vmem:[%s1217_s12 + $0x50] sm:$0xff] %v882_v47  ;;  %885 = vst [vmem:[%s1217_s12 + $0x58] sm:$0xff] %v884_v9  ;;  %v888_v33 = vld [vmem:[%s1221_s14 + $0x68] sm:$0xff]  ;;  %v890_v36 = vld [vmem:[%s1221_s14 + $0x70] sm:$0xff] }
 0x184   : >> { %887 = vst [vmem:[%s1217_s12 + $0x60] sm:$0xff] %v886_v51  ;;  %889 = vst [vmem:[%s1217_s12 + $0x68] sm:$0xff] %v888_v33  ;;  %v892_v46 = vld [vmem:[%s1221_s14 + $0x78] sm:$0xff]  ;;  %s899_s14 = scalar_lea.vmem %s1724_s3, %s1056_s19 [#allocation2]  }
 0x185   : >> { %891 = vst [vmem:[%s1217_s12 + $0x70] sm:$0xff] %v890_v36  ;;  %893 = vst [vmem:[%s1217_s12 + $0x78] sm:$0xff] %v892_v46  ;;  %s900_s12 = scalar_lea.vmem %s1790_s8, %s1056_s19  }
 0x187 PF: > { %s1865_s20 = sand.u32 15, %s1918_s4   ;;  %s1067_s21 = sshll.u32 %s1796_s11, 7 }
 0x188   : > { %s905_s22 = scalar_lea.vmem %s1724_s3, %s1067_s21 [#allocation2]   ;;  %s907_s23 = scalar_lea.vmem %s1790_s8, %s1067_s21  }
 0x189   : > { %p1061_p13 = scmp.le.s32.totalorder %s1865_s20, 0 }
 0x18a   : > { %s1231_s24 = smov (!%p1061_p13), %s907_s23   ;;  %s1235_s25 = smov (!%p1061_p13), %s905_s22  }
 0x18b   : > { %1004 = sbr.rel (%p1061_p13) target bundleno = 408 (0x198), region = 126  ;;  %s1239_s26 = smov (!%p1061_p13), 0  }
 0x18c   : > { %s1243_s27 = smov (!%p1061_p13), 0  }
 0x190 LB: >> { %v917_v59 = vld [vmem:[%s1237_s25] sm:$0xff]  ;;  %s919_s28 = sadd.s32 1, %s1241_s26  ;;  %s911_s27 = sadd.s32 1, %s1245_s27   ;;  %s1245_s27 = sphi %s1243_s27, %s911_s27   ;;  %s1241_s26 = sphi %s1239_s26, %s1240_s26   ;;  %s1237_s25 = sphi %s1235_s25, %s924_s25   ;;  %s1233_s24 = sphi %s1231_s24, %s925_s24  }
 0x191   : >> { %918 = vst [vmem:[%s1233_s24] sm:$0xff] %v917_v59  ;;  %p920_p0 = scmp.ge.s32.totalorder %s919_s28, %s1865_s20  ;;  %p910_p1 = scmp.ge.s32.totalorder %s911_s27, %s1865_s20 }
 0x193   : >> { %s1922_s28 = smov (%p920_p0, %s919_s28), 0  ;;  %913 = sbr.rel (!%p910_p1) target bundleno = 400 (0x190), region = 132 }
 0x194   : >> { %s1062_s29 = sshll.u32 %s1922_s28, 3  ;;  %s1240_s26 = smov %s1922_s28  }
 0x195   : >> { %s924_s25 = scalar_lea.vmem %s905_s22, %s1062_s29 [#allocation2]   ;;  %s925_s24 = scalar_lea.vmem %s907_s23, %s1062_s29  }
 0x198 PF: > { %p9_p2 = scmp.ge.s32.totalorder %s1279_s13, 5   ;;  %s1914_s9 = smov %s1209_s10 }
 0x199   : > { %s1915_s10 = smov %s1287_s16  ;;  %s1916_s11 = smov %s1279_s13 }
 0x19a   :  { %11 = sbr.rel (!%p9_p2) target bundleno = 2 (0x2), region = 143 }

</bundles_post_ra>
